<compile_context>
chip_gen: v7x
topology: tpu7x:2x2x1
jax: 0.10.0
libtpu: 0.0.40
codegen_flags: <defaults>
</compile_context>

<pallas_src>
import jax
import jax.numpy as jnp
import numpy as np
from jax.experimental import pallas as pl
from jax.experimental.pallas import tpu as pltpu

# ----- model hyper-parameters (input_dim kept small; it is a constructor arg, default 1404) -----
INPUT_DIM   = 256
NUM_CLASSES = 5
D_MODEL     = 128
NHEAD       = 4        # head split is a no-op for seq_len == 1 (softmax over one key == 1)
NUM_LAYERS  = 2
DIM_FF      = 256
LN_EPS      = 1e-5
BATCH       = 8
OUT_PAD     = 128      # lane-dense padded classifier width (>= NUM_CLASSES)

# packed f32 bias / LN-param slab layout: (BVEC_ROWS, BVEC_W), 128-wide rows zero-padded to 256
BVEC_W      = 256
BVEC_ROWS   = 16
# rows: 0 bx | 1 g1_0 | 2 b1_0(LN) | 3 ffb1_0(256) | 4 ffb2_0 | 5 ba1'
#       6 g1_1 | 7 b1_1(LN) | 8 ffb1_1(256) | 9 ffb2_1 | 10 bfc'
# packed bf16 weight slab row ranges (width 128):
#   Wx [0,256) | W2_0 [256,512) | A1' [512,640) | W2_1 [640,896) | Wfc' [896,1024)
# packed bf16 weight slab row ranges (width 256):  W1_0 [0,128) | W1_1 [128,256)


def emotion_transformer_kernel(x_ref, w128_ref, w256_ref, bvec_ref, out_ref):
    f32, bf16 = jnp.float32, jnp.bfloat16
    b = bvec_ref[...]                                   # (16, 256) f32

    def bias128(r):
        return b[r:r + 1, 0:D_MODEL]                    # (1, 128)

    def bias256(r):
        return b[r:r + 1, :]                            # (1, 256)

    def normalize(v):
        # LayerNorm normalization only (affine applied by caller or folded into next matmul).
        mu  = jnp.mean(v, axis=-1, keepdims=True)
        var = jnp.mean(v * v, axis=-1, keepdims=True) - mu * mu
        return (v - mu) * jax.lax.rsqrt(var + LN_EPS)

    def dot_bf16(a_f32, w_bf16):
        # cast the tiny activation tile to bf16; weights already bf16; f32 accumulation on MXU
        return jnp.dot(a_f32.astype(bf16), w_bf16, preferred_element_type=f32)

    # fused: embedding -> layer-0 attention (+ residual), all one matmul
    z = dot_bf16(x_ref[...], w128_ref[0:256, :]) + bias128(0)

    # ---- layer 0 ----
    h  = normalize(z) * bias128(1) + bias128(2)                         # norm1 (affine kept: feeds residual)
    ff = jnp.maximum(dot_bf16(h, w256_ref[0:128, :]) + bias256(3), 0.0) # linear1 + ReLU
    z  = h + dot_bf16(ff, w128_ref[256:512, :]) + bias128(4)            # linear2 + residual
    u  = normalize(z)                                                   # norm2 (affine folded into A1')

    # ---- layer 1 ----
    z  = dot_bf16(u, w128_ref[512:640, :]) + bias128(5)                 # attn (+ residual + norm2_0 affine)
    h  = normalize(z) * bias128(6) + bias128(7)                         # norm1
    ff = jnp.maximum(dot_bf16(h, w256_ref[128:256, :]) + bias256(8), 0.0)
    z  = h + dot_bf16(ff, w128_ref[640:896, :]) + bias128(9)
    u  = normalize(z)                                                   # norm2 (affine folded into fc)

    # mean over the length-1 sequence axis is identity; classifier head, lane-dense (TB,128) store.
    out_ref[...] = (dot_bf16(u, w128_ref[896:1024, :]) + bias128(10)).astype(out_ref.dtype)


def init_params(key):
    """PyTorch-convention parameters: every Linear is W:(out_features, in_features), y = x@W.T + b."""
    ks = jax.random.split(key, 16)
    s = 0.05
    L, D, F = NUM_LAYERS, D_MODEL, DIM_FF
    return {
        "emb_w": jax.random.normal(ks[0], (D, INPUT_DIM), jnp.float32) * s,
        "emb_b": jax.random.normal(ks[1], (1, D), jnp.float32) * s,
        "ipw":   jax.random.normal(ks[2], (L, 3 * D, D), jnp.float32) * s,
        "ipb":   jax.random.normal(ks[3], (L, 1, 3 * D), jnp.float32) * s,
        "opw":   jax.random.normal(ks[4], (L, D, D), jnp.float32) * s,
        "opb":   jax.random.normal(ks[5], (L, 1, D), jnp.float32) * s,
        "n1w":   1.0 + jax.random.normal(ks[6], (L, 1, D), jnp.float32) * s,
        "n1b":   jax.random.normal(ks[7], (L, 1, D), jnp.float32) * s,
        "l1w":   jax.random.normal(ks[8], (L, F, D), jnp.float32) * s,
        "l1b":   jax.random.normal(ks[9], (L, 1, F), jnp.float32) * s,
        "l2w":   jax.random.normal(ks[10], (L, D, F), jnp.float32) * s,
        "l2b":   jax.random.normal(ks[11], (L, 1, D), jnp.float32) * s,
        "n2w":   1.0 + jax.random.normal(ks[12], (L, 1, D), jnp.float32) * s,
        "n2b":   jax.random.normal(ks[13], (L, 1, D), jnp.float32) * s,
        "fcw":   jax.random.normal(ks[14], (NUM_CLASSES, D), jnp.float32) * s,
        "fcb":   jax.random.normal(ks[15], (1, NUM_CLASSES), jnp.float32) * s,
    }


def prepare_params(p):
    """One-time host prep: fold attention/residual/embedding/LN-affines, pre-transpose, pack slabs."""
    D, F, C = D_MODEL, DIM_FF, NUM_CLASSES
    f32, bf16 = jnp.float32, jnp.bfloat16
    hi = jax.lax.Precision.HIGHEST

    # seq_len==1 attention fold: attn(h) = h @ (Wo@Wv).T + (Wo@bv + bo)
    Wv = p["ipw"][:, 2 * D:3 * D, :]                                  # (L, D, D)
    bv = p["ipb"][:, 0, 2 * D:3 * D]                                  # (L, D)
    Wo, bo = p["opw"], p["opb"][:, 0, :]
    Wa = jnp.einsum("lab,lbc->lca", Wo, Wv, precision=hi)             # (L, D, D) pre-transposed
    ba = jnp.einsum("lab,lb->la", Wo, bv, precision=hi) + bo          # (L, D)
    A = Wa + jnp.eye(D, dtype=f32)[None]                              # residual fold: z = h @ A + ba

    # fold the embedding Linear into layer-0's attention matmul
    Wx = jnp.dot(p["emb_w"].T, A[0], precision=hi)                    # (INPUT_DIM, D)
    bx = jnp.dot(p["emb_b"][0], A[0], precision=hi) + ba[0]           # (D,)

    # fold layer-0 norm2 affine into layer-1's attention matmul
    A1  = p["n2w"][0, 0][:, None] * A[1]                              # (D, D)
    ba1 = jnp.dot(p["n2b"][0, 0], A[1], precision=hi) + ba[1]         # (D,)

    # fold layer-1 norm2 affine into the classifier head; pad head to 128 lanes
    WfcT = jnp.pad(p["fcw"].T, ((0, 0), (0, OUT_PAD - C)))            # (D, OUT_PAD)
    Wfc  = p["n2w"][1, 0][:, None] * WfcT                             # (D, OUT_PAD)
    bfc  = jnp.dot(p["n2b"][1, 0], WfcT, precision=hi) + jnp.pad(p["fcb"][0], (0, OUT_PAD - C))

    # FF weights pre-transposed to (in, out)
    W1 = jnp.transpose(p["l1w"], (0, 2, 1))                           # (L, D, F)
    W2 = jnp.transpose(p["l2w"], (0, 2, 1))                           # (L, F, D)

    # bf16 weight slabs
    w128 = jnp.concatenate([Wx, W2[0], A1, W2[1], Wfc], axis=0).astype(bf16)   # (1024, 128)
    w256 = jnp.concatenate([W1[0], W1[1]], axis=0).astype(bf16)                # (256, 256)

    # f32 bias / LN-param slab (width 256; 128-wide rows zero-padded)
    def row(v):
        return jnp.pad(v, (0, BVEC_W - v.shape[0]))

    rows = [
        row(bx),                                                      # 0
        row(p["n1w"][0, 0]), row(p["n1b"][0, 0]),                     # 1, 2
        p["l1b"][0, 0],                                               # 3 (256-wide)
        row(p["l2b"][0, 0]),                                          # 4
        row(ba1),                                                     # 5
        row(p["n1w"][1, 0]), row(p["n1b"][1, 0]),                     # 6, 7
        p["l1b"][1, 0],                                               # 8 (256-wide)
        row(p["l2b"][1, 0]),                                          # 9
        row(bfc),                                                     # 10
    ]
    bvec = jnp.stack(rows, axis=0)
    bvec = jnp.pad(bvec, ((0, BVEC_ROWS - bvec.shape[0]), (0, 0))).astype(f32)

    return {"w128": w128, "w256": w256, "bvec": bvec}


def _pick_tb(B):
    # Tiny batches (the test path): single tile, grid=(1,).
    # Large batches: split into >=2 "parallel" grid steps so both v7x TensorCores are used, and
    # cap the tile at 1024 rows so double-buffered (TB,256) f32 input + f32 FF intermediates stay
    # comfortably inside v7x's 64 MiB VMEM (v5e/v6e have 2x the VMEM, so the same cap is safe).
    if B <= 256:
        return B
    for tb in (1024, 512, 256, 128, 64, 32, 16, 8):
        if B % tb == 0:
            return tb
    return B


@jax.jit
def emotion_transformer(x, prep):
    B = x.shape[0]
    TB = _pick_tb(B)
    wconst = lambda i: (0, 0)   # weight slabs: constant index map -> stay resident across steps

    out = pl.pallas_call(
        emotion_transformer_kernel,
        out_shape=jax.ShapeDtypeStruct((B, OUT_PAD), jnp.float32),
        grid=(B // TB,),
        in_specs=[
            pl.BlockSpec((TB, INPUT_DIM), lambda i: (i, 0)),
            pl.BlockSpec(prep["w128"].shape, wconst),
            pl.BlockSpec(prep["w256"].shape, wconst),
            pl.BlockSpec(prep["bvec"].shape, wconst),
        ],
        out_specs=pl.BlockSpec((TB, OUT_PAD), lambda i: (i, 0)),
        compiler_params=pltpu.CompilerParams(dimension_semantics=("parallel",)),
    )(x, prep["w128"], prep["w256"], prep["bvec"])
    return out[:, :NUM_CLASSES]


def reference_forward(x, p):
    """Pure-JAX f32 reference mirroring the PyTorch eval-mode forward pass exactly."""
    hi = jax.lax.Precision.HIGHEST

    def ln(v, w, b):
        mu = jnp.mean(v, axis=-1, keepdims=True)
        var = jnp.mean((v - mu) ** 2, axis=-1, keepdims=True)
        return (v - mu) / jnp.sqrt(var + LN_EPS) * w + b

    h = jnp.dot(x, p["emb_w"].T, precision=hi) + p["emb_b"][0]
    for l in range(NUM_LAYERS):
        qkv = jnp.dot(h, p["ipw"][l].T, precision=hi) + p["ipb"][l, 0]
        v = qkv[:, 2 * D_MODEL:3 * D_MODEL]          # softmax over seq_len==1 is identity
        attn = jnp.dot(v, p["opw"][l].T, precision=hi) + p["opb"][l, 0]
        h = ln(h + attn, p["n1w"][l, 0], p["n1b"][l, 0])
        ff = jnp.maximum(jnp.dot(h, p["l1w"][l].T, precision=hi) + p["l1b"][l, 0], 0.0)
        ff = jnp.dot(ff, p["l2w"][l].T, precision=hi) + p["l2b"][l, 0]
        h = ln(h + ff, p["n2w"][l, 0], p["n2b"][l, 0])
    return jnp.dot(h, p["fcw"].T, precision=hi) + p["fcb"][0]


def reference_from_prepared(x, prep):
    """Pure-JAX reference mirroring the kernel math on the prepared slabs (tight plumbing check)."""
    f32, bf16 = jnp.float32, jnp.bfloat16
    b, w128, w256 = prep["bvec"], prep["w128"], prep["w256"]

    def b128(r):
        return b[r, 0:D_MODEL]

    def normalize(v):
        mu = jnp.mean(v, axis=-1, keepdims=True)
        var = jnp.mean(v * v, axis=-1, keepdims=True) - mu * mu
        return (v - mu) * jax.lax.rsqrt(var + LN_EPS)

    def dot_bf16(a, w):
        return jnp.dot(a.astype(bf16), w, preferred_element_type=f32)

    z = dot_bf16(x, w128[0:256]) + b128(0)
    h = normalize(z) * b128(1) + b128(2)
    ff = jnp.maximum(dot_bf16(h, w256[0:128]) + b[3], 0.0)
    z = h + dot_bf16(ff, w128[256:512]) + b128(4)
    u = normalize(z)
    z = dot_bf16(u, w128[512:640]) + b128(5)
    h = normalize(z) * b128(6) + b128(7)
    ff = jnp.maximum(dot_bf16(h, w256[128:256]) + b[8], 0.0)
    z = h + dot_bf16(ff, w128[640:896]) + b128(9)
    u = normalize(z)
    out = dot_bf16(u, w128[896:1024]) + b128(10)
    return out[:, :NUM_CLASSES]


if __name__ == "__main__":
    key = jax.random.PRNGKey(0)
    kx, kp = jax.random.split(key)
    x = jax.random.normal(kx, (BATCH, INPUT_DIM), jnp.float32)
    params = init_params(kp)
    prep = prepare_params(params)

    out = emotion_transformer(x, prep)
    out = jax.block_until_ready(out)
    assert out.shape == (BATCH, NUM_CLASSES)

    # Tight check: identical folded/packed bf16 weights and bf16-activation matmul math.
    ref_prep = reference_from_prepared(x, prep)
    np.testing.assert_allclose(np.asarray(out), np.asarray(ref_prep), rtol=2e-3, atol=2e-3)

    # Semantics check vs. the exact f32 PyTorch-style forward; tolerance covers bf16 weights/activations.
    ref_f32 = reference_forward(x, params)
    np.testing.assert_allclose(np.asarray(out), np.asarray(ref_f32), rtol=5e-2, atol=5e-2)

    print("KERNEL_OK")
</pallas_src>

<mosaic_0001>
module attributes {stable_mosaic.version = 11 : i64} {
  func.func @emotion_transformer_kernel(%arg0: i32, %arg1: memref<8x256xf32, #tpu.memory_space<vmem>>, %arg2: memref<1024x128xbf16, #tpu.memory_space<vmem>>, %arg3: memref<256x256xbf16, #tpu.memory_space<vmem>>, %arg4: memref<16x256xf32, #tpu.memory_space<vmem>>, %arg5: memref<8x128xf32, #tpu.memory_space<vmem>>) attributes {dimension_semantics = [#tpu.dimension_semantics<parallel>], iteration_bounds = array<i64: 1>, scalar_prefetch = 0 : i64, scratch_operands = 0 : i64, tpu.core_type = #tpu.core_type<tc>, window_params = [{transform_indices = @transform_0, window_bounds = array<i64: 8, 256>}, {pipeline_mode = #tpu.pipeline_mode<synchronous>, transform_indices = @transform_1, window_bounds = array<i64: 1024, 128>}, {pipeline_mode = #tpu.pipeline_mode<synchronous>, transform_indices = @transform_2, window_bounds = array<i64: 256, 256>}, {pipeline_mode = #tpu.pipeline_mode<synchronous>, transform_indices = @transform_3, window_bounds = array<i64: 16, 256>}, {transform_indices = @transform_4, window_bounds = array<i64: 8, 128>}]} {
    %c0 = arith.constant 0 : index
    %c0_0 = arith.constant 0 : index
    %0 = vector.load %arg4[%c0, %c0_0] : memref<16x256xf32, #tpu.memory_space<vmem>>, vector<16x256xf32>
    %c0_1 = arith.constant 0 : index
    %c0_2 = arith.constant 0 : index
    %1 = vector.load %arg1[%c0_1, %c0_2] : memref<8x256xf32, #tpu.memory_space<vmem>>, vector<8x256xf32>
    %c0_3 = arith.constant 0 : index
    %c0_4 = arith.constant 0 : index
    %2 = vector.load %arg2[%c0_3, %c0_4] : memref<1024x128xbf16, #tpu.memory_space<vmem>>, vector<256x128xbf16>
    %3 = arith.truncf %1 : vector<8x256xf32> to vector<8x256xbf16>
    %cst = arith.constant dense<0.000000e+00> : vector<8x128xf32>
    %4 = tpu.matmul %3, %2, %cst {dimension_numbers = #tpu.dot_dimension_numbers<[1], [0], [0], [1], [0, 0, 1, 1], [], []>} : vector<8x256xbf16>, vector<256x128xbf16>, vector<8x128xf32> -> vector<8x128xf32>
    %5 = vector.extract_strided_slice %0 {offsets = [0, 0], sizes = [1, 128], strides = [1, 1]} : vector<16x256xf32> to vector<1x128xf32>
    %6 = vector.broadcast %5 : vector<1x128xf32> to vector<8x128xf32>
    %7 = arith.addf %4, %6 : vector<8x128xf32>
    %cst_5 = arith.constant dense<0.000000e+00> : vector<8xf32>
    %8 = vector.multi_reduction <add>, %7, %cst_5 [1] : vector<8x128xf32> to vector<8xf32>
    %9 = vector.shape_cast %8 : vector<8xf32> to vector<8x1xf32>
    %cst_6 = arith.constant 1.280000e+02 : f32
    %10 = vector.broadcast %cst_6 : f32 to vector<8x1xf32>
    %11 = arith.divf %9, %10 : vector<8x1xf32>
    %12 = arith.mulf %7, %7 : vector<8x128xf32>
    %cst_7 = arith.constant dense<0.000000e+00> : vector<8xf32>
    %13 = vector.multi_reduction <add>, %12, %cst_7 [1] : vector<8x128xf32> to vector<8xf32>
    %14 = vector.shape_cast %13 : vector<8xf32> to vector<8x1xf32>
    %cst_8 = arith.constant 1.280000e+02 : f32
    %15 = vector.broadcast %cst_8 : f32 to vector<8x1xf32>
    %16 = arith.divf %14, %15 : vector<8x1xf32>
    %17 = arith.mulf %11, %11 : vector<8x1xf32>
    %18 = arith.subf %16, %17 : vector<8x1xf32>
    %19 = vector.broadcast %11 : vector<8x1xf32> to vector<8x128xf32>
    %20 = arith.subf %7, %19 : vector<8x128xf32>
    %cst_9 = arith.constant 9.99999974E-6 : f32
    %21 = vector.broadcast %cst_9 : f32 to vector<8x1xf32>
    %22 = arith.addf %18, %21 : vector<8x1xf32>
    %23 = math.rsqrt %22 : vector<8x1xf32>
    %24 = vector.broadcast %23 : vector<8x1xf32> to vector<8x128xf32>
    %25 = arith.mulf %20, %24 : vector<8x128xf32>
    %26 = vector.extract_strided_slice %0 {offsets = [1, 0], sizes = [1, 128], strides = [1, 1]} : vector<16x256xf32> to vector<1x128xf32>
    %27 = vector.broadcast %26 : vector<1x128xf32> to vector<8x128xf32>
    %28 = arith.mulf %25, %27 : vector<8x128xf32>
    %29 = vector.extract_strided_slice %0 {offsets = [2, 0], sizes = [1, 128], strides = [1, 1]} : vector<16x256xf32> to vector<1x128xf32>
    %30 = vector.broadcast %29 : vector<1x128xf32> to vector<8x128xf32>
    %31 = arith.addf %28, %30 : vector<8x128xf32>
    %c0_10 = arith.constant 0 : index
    %c0_11 = arith.constant 0 : index
    %32 = vector.load %arg3[%c0_10, %c0_11] : memref<256x256xbf16, #tpu.memory_space<vmem>>, vector<128x256xbf16>
    %33 = arith.truncf %31 : vector<8x128xf32> to vector<8x128xbf16>
    %cst_12 = arith.constant dense<0.000000e+00> : vector<8x256xf32>
    %34 = tpu.matmul %33, %32, %cst_12 {dimension_numbers = #tpu.dot_dimension_numbers<[1], [0], [0], [1], [0, 0, 1, 1], [], []>} : vector<8x128xbf16>, vector<128x256xbf16>, vector<8x256xf32> -> vector<8x256xf32>
    %35 = vector.extract_strided_slice %0 {offsets = [3, 0], sizes = [1, 256], strides = [1, 1]} : vector<16x256xf32> to vector<1x256xf32>
    %36 = vector.broadcast %35 : vector<1x256xf32> to vector<8x256xf32>
    %37 = arith.addf %34, %36 : vector<8x256xf32>
    %cst_13 = arith.constant 0.000000e+00 : f32
    %38 = vector.broadcast %cst_13 : f32 to vector<8x256xf32>
    %39 = arith.maximumf %37, %38 : vector<8x256xf32>
    %c256 = arith.constant 256 : index
    %c0_14 = arith.constant 0 : index
    %40 = vector.load %arg2[%c256, %c0_14] : memref<1024x128xbf16, #tpu.memory_space<vmem>>, vector<256x128xbf16>
    %41 = arith.truncf %39 : vector<8x256xf32> to vector<8x256xbf16>
    %cst_15 = arith.constant dense<0.000000e+00> : vector<8x128xf32>
    %42 = tpu.matmul %41, %40, %cst_15 {dimension_numbers = #tpu.dot_dimension_numbers<[1], [0], [0], [1], [0, 0, 1, 1], [], []>} : vector<8x256xbf16>, vector<256x128xbf16>, vector<8x128xf32> -> vector<8x128xf32>
    %43 = arith.addf %31, %42 : vector<8x128xf32>
    %44 = vector.extract_strided_slice %0 {offsets = [4, 0], sizes = [1, 128], strides = [1, 1]} : vector<16x256xf32> to vector<1x128xf32>
    %45 = vector.broadcast %44 : vector<1x128xf32> to vector<8x128xf32>
    %46 = arith.addf %43, %45 : vector<8x128xf32>
    %cst_16 = arith.constant dense<0.000000e+00> : vector<8xf32>
    %47 = vector.multi_reduction <add>, %46, %cst_16 [1] : vector<8x128xf32> to vector<8xf32>
    %48 = vector.shape_cast %47 : vector<8xf32> to vector<8x1xf32>
    %cst_17 = arith.constant 1.280000e+02 : f32
    %49 = vector.broadcast %cst_17 : f32 to vector<8x1xf32>
    %50 = arith.divf %48, %49 : vector<8x1xf32>
    %51 = arith.mulf %46, %46 : vector<8x128xf32>
    %cst_18 = arith.constant dense<0.000000e+00> : vector<8xf32>
    %52 = vector.multi_reduction <add>, %51, %cst_18 [1] : vector<8x128xf32> to vector<8xf32>
    %53 = vector.shape_cast %52 : vector<8xf32> to vector<8x1xf32>
    %cst_19 = arith.constant 1.280000e+02 : f32
    %54 = vector.broadcast %cst_19 : f32 to vector<8x1xf32>
    %55 = arith.divf %53, %54 : vector<8x1xf32>
    %56 = arith.mulf %50, %50 : vector<8x1xf32>
    %57 = arith.subf %55, %56 : vector<8x1xf32>
    %58 = vector.broadcast %50 : vector<8x1xf32> to vector<8x128xf32>
    %59 = arith.subf %46, %58 : vector<8x128xf32>
    %cst_20 = arith.constant 9.99999974E-6 : f32
    %60 = vector.broadcast %cst_20 : f32 to vector<8x1xf32>
    %61 = arith.addf %57, %60 : vector<8x1xf32>
    %62 = math.rsqrt %61 : vector<8x1xf32>
    %63 = vector.broadcast %62 : vector<8x1xf32> to vector<8x128xf32>
    %64 = arith.mulf %59, %63 : vector<8x128xf32>
    %c512 = arith.constant 512 : index
    %c0_21 = arith.constant 0 : index
    %65 = vector.load %arg2[%c512, %c0_21] : memref<1024x128xbf16, #tpu.memory_space<vmem>>, vector<128x128xbf16>
    %66 = arith.truncf %64 : vector<8x128xf32> to vector<8x128xbf16>
    %cst_22 = arith.constant dense<0.000000e+00> : vector<8x128xf32>
    %67 = tpu.matmul %66, %65, %cst_22 {dimension_numbers = #tpu.dot_dimension_numbers<[1], [0], [0], [1], [0, 0, 1, 1], [], []>} : vector<8x128xbf16>, vector<128x128xbf16>, vector<8x128xf32> -> vector<8x128xf32>
    %68 = vector.extract_strided_slice %0 {offsets = [5, 0], sizes = [1, 128], strides = [1, 1]} : vector<16x256xf32> to vector<1x128xf32>
    %69 = vector.broadcast %68 : vector<1x128xf32> to vector<8x128xf32>
    %70 = arith.addf %67, %69 : vector<8x128xf32>
    %cst_23 = arith.constant dense<0.000000e+00> : vector<8xf32>
    %71 = vector.multi_reduction <add>, %70, %cst_23 [1] : vector<8x128xf32> to vector<8xf32>
    %72 = vector.shape_cast %71 : vector<8xf32> to vector<8x1xf32>
    %cst_24 = arith.constant 1.280000e+02 : f32
    %73 = vector.broadcast %cst_24 : f32 to vector<8x1xf32>
    %74 = arith.divf %72, %73 : vector<8x1xf32>
    %75 = arith.mulf %70, %70 : vector<8x128xf32>
    %cst_25 = arith.constant dense<0.000000e+00> : vector<8xf32>
    %76 = vector.multi_reduction <add>, %75, %cst_25 [1] : vector<8x128xf32> to vector<8xf32>
    %77 = vector.shape_cast %76 : vector<8xf32> to vector<8x1xf32>
    %cst_26 = arith.constant 1.280000e+02 : f32
    %78 = vector.broadcast %cst_26 : f32 to vector<8x1xf32>
    %79 = arith.divf %77, %78 : vector<8x1xf32>
    %80 = arith.mulf %74, %74 : vector<8x1xf32>
    %81 = arith.subf %79, %80 : vector<8x1xf32>
    %82 = vector.broadcast %74 : vector<8x1xf32> to vector<8x128xf32>
    %83 = arith.subf %70, %82 : vector<8x128xf32>
    %cst_27 = arith.constant 9.99999974E-6 : f32
    %84 = vector.broadcast %cst_27 : f32 to vector<8x1xf32>
    %85 = arith.addf %81, %84 : vector<8x1xf32>
    %86 = math.rsqrt %85 : vector<8x1xf32>
    %87 = vector.broadcast %86 : vector<8x1xf32> to vector<8x128xf32>
    %88 = arith.mulf %83, %87 : vector<8x128xf32>
    %89 = vector.extract_strided_slice %0 {offsets = [6, 0], sizes = [1, 128], strides = [1, 1]} : vector<16x256xf32> to vector<1x128xf32>
    %90 = vector.broadcast %89 : vector<1x128xf32> to vector<8x128xf32>
    %91 = arith.mulf %88, %90 : vector<8x128xf32>
    %92 = vector.extract_strided_slice %0 {offsets = [7, 0], sizes = [1, 128], strides = [1, 1]} : vector<16x256xf32> to vector<1x128xf32>
    %93 = vector.broadcast %92 : vector<1x128xf32> to vector<8x128xf32>
    %94 = arith.addf %91, %93 : vector<8x128xf32>
    %c128 = arith.constant 128 : index
    %c0_28 = arith.constant 0 : index
    %95 = vector.load %arg3[%c128, %c0_28] : memref<256x256xbf16, #tpu.memory_space<vmem>>, vector<128x256xbf16>
    %96 = arith.truncf %94 : vector<8x128xf32> to vector<8x128xbf16>
    %cst_29 = arith.constant dense<0.000000e+00> : vector<8x256xf32>
    %97 = tpu.matmul %96, %95, %cst_29 {dimension_numbers = #tpu.dot_dimension_numbers<[1], [0], [0], [1], [0, 0, 1, 1], [], []>} : vector<8x128xbf16>, vector<128x256xbf16>, vector<8x256xf32> -> vector<8x256xf32>
    %98 = vector.extract_strided_slice %0 {offsets = [8, 0], sizes = [1, 256], strides = [1, 1]} : vector<16x256xf32> to vector<1x256xf32>
    %99 = vector.broadcast %98 : vector<1x256xf32> to vector<8x256xf32>
    %100 = arith.addf %97, %99 : vector<8x256xf32>
    %cst_30 = arith.constant 0.000000e+00 : f32
    %101 = vector.broadcast %cst_30 : f32 to vector<8x256xf32>
    %102 = arith.maximumf %100, %101 : vector<8x256xf32>
    %c640 = arith.constant 640 : index
    %c0_31 = arith.constant 0 : index
    %103 = vector.load %arg2[%c640, %c0_31] : memref<1024x128xbf16, #tpu.memory_space<vmem>>, vector<256x128xbf16>
    %104 = arith.truncf %102 : vector<8x256xf32> to vector<8x256xbf16>
    %cst_32 = arith.constant dense<0.000000e+00> : vector<8x128xf32>
    %105 = tpu.matmul %104, %103, %cst_32 {dimension_numbers = #tpu.dot_dimension_numbers<[1], [0], [0], [1], [0, 0, 1, 1], [], []>} : vector<8x256xbf16>, vector<256x128xbf16>, vector<8x128xf32> -> vector<8x128xf32>
    %106 = arith.addf %94, %105 : vector<8x128xf32>
    %107 = vector.extract_strided_slice %0 {offsets = [9, 0], sizes = [1, 128], strides = [1, 1]} : vector<16x256xf32> to vector<1x128xf32>
    %108 = vector.broadcast %107 : vector<1x128xf32> to vector<8x128xf32>
    %109 = arith.addf %106, %108 : vector<8x128xf32>
    %cst_33 = arith.constant dense<0.000000e+00> : vector<8xf32>
    %110 = vector.multi_reduction <add>, %109, %cst_33 [1] : vector<8x128xf32> to vector<8xf32>
    %111 = vector.shape_cast %110 : vector<8xf32> to vector<8x1xf32>
    %cst_34 = arith.constant 1.280000e+02 : f32
    %112 = vector.broadcast %cst_34 : f32 to vector<8x1xf32>
    %113 = arith.divf %111, %112 : vector<8x1xf32>
    %114 = arith.mulf %109, %109 : vector<8x128xf32>
    %cst_35 = arith.constant dense<0.000000e+00> : vector<8xf32>
    %115 = vector.multi_reduction <add>, %114, %cst_35 [1] : vector<8x128xf32> to vector<8xf32>
    %116 = vector.shape_cast %115 : vector<8xf32> to vector<8x1xf32>
    %cst_36 = arith.constant 1.280000e+02 : f32
    %117 = vector.broadcast %cst_36 : f32 to vector<8x1xf32>
    %118 = arith.divf %116, %117 : vector<8x1xf32>
    %119 = arith.mulf %113, %113 : vector<8x1xf32>
    %120 = arith.subf %118, %119 : vector<8x1xf32>
    %121 = vector.broadcast %113 : vector<8x1xf32> to vector<8x128xf32>
    %122 = arith.subf %109, %121 : vector<8x128xf32>
    %cst_37 = arith.constant 9.99999974E-6 : f32
    %123 = vector.broadcast %cst_37 : f32 to vector<8x1xf32>
    %124 = arith.addf %120, %123 : vector<8x1xf32>
    %125 = math.rsqrt %124 : vector<8x1xf32>
    %126 = vector.broadcast %125 : vector<8x1xf32> to vector<8x128xf32>
    %127 = arith.mulf %122, %126 : vector<8x128xf32>
    %c896 = arith.constant 896 : index
    %c0_38 = arith.constant 0 : index
    %128 = vector.load %arg2[%c896, %c0_38] : memref<1024x128xbf16, #tpu.memory_space<vmem>>, vector<128x128xbf16>
    %129 = arith.truncf %127 : vector<8x128xf32> to vector<8x128xbf16>
    %cst_39 = arith.constant dense<0.000000e+00> : vector<8x128xf32>
    %130 = tpu.matmul %129, %128, %cst_39 {dimension_numbers = #tpu.dot_dimension_numbers<[1], [0], [0], [1], [0, 0, 1, 1], [], []>} : vector<8x128xbf16>, vector<128x128xbf16>, vector<8x128xf32> -> vector<8x128xf32>
    %131 = vector.extract_strided_slice %0 {offsets = [10, 0], sizes = [1, 128], strides = [1, 1]} : vector<16x256xf32> to vector<1x128xf32>
    %132 = vector.broadcast %131 : vector<1x128xf32> to vector<8x128xf32>
    %133 = arith.addf %130, %132 : vector<8x128xf32>
    %c0_40 = arith.constant 0 : index
    %c0_41 = arith.constant 0 : index
    %134 = vector.load %arg5[%c0_40, %c0_41] : memref<8x128xf32, #tpu.memory_space<vmem>>, vector<8x128xf32>
    tpu.vector_store %arg5[%c0_40, %c0_41], %133 {strides = array<i32>} : memref<8x128xf32, #tpu.memory_space<vmem>>, vector<8x128xf32>,
    return
  }
  func.func @transform_0(%arg0: i32) -> (i32, i32) {
    %c0_i32 = arith.constant 0 : i32
    %c0_i32_0 = arith.constant 0 : i32
    return %arg0, %c0_i32 : i32, i32
  }
  func.func @transform_1(%arg0: i32) -> (i32, i32) {
    %c0_i32 = arith.constant 0 : i32
    %c0_i32_0 = arith.constant 0 : i32
    %c0_i32_1 = arith.constant 0 : i32
    return %c0_i32, %c0_i32_0 : i32, i32
  }
  func.func @transform_2(%arg0: i32) -> (i32, i32) {
    %c0_i32 = arith.constant 0 : i32
    %c0_i32_0 = arith.constant 0 : i32
    %c0_i32_1 = arith.constant 0 : i32
    return %c0_i32, %c0_i32_0 : i32, i32
  }
  func.func @transform_3(%arg0: i32) -> (i32, i32) {
    %c0_i32 = arith.constant 0 : i32
    %c0_i32_0 = arith.constant 0 : i32
    %c0_i32_1 = arith.constant 0 : i32
    return %c0_i32, %c0_i32_0 : i32, i32
  }
  func.func @transform_4(%arg0: i32) -> (i32, i32) {
    %c0_i32 = arith.constant 0 : i32
    %c0_i32_0 = arith.constant 0 : i32
    return %arg0, %c0_i32 : i32, i32
  }
}

</mosaic_0001>

<bundles_post_ra>
// kernel: emotion_transformer.1
= control target key start
LH: loop header
LB: loop body
LE: loop exit
PB: predicated region body
PF: predicated region fallthrough
CT: control target
= control target key end

     0   :  { %9 = vsyncpa [#allocation3], 0  ;;  %s1852_s0 = inlined_call_operand.hbm [shape: f32[8,256], index: 0, kind: input, shape index: {}]   ;;  %s1853_s1 = inlined_call_operand.hbm [shape: bf16[1024,128], index: 1, kind: input, shape index: {}]   ;;  %s1854_s2 = inlined_call_operand.hbm [shape: bf16[256,256], index: 2, kind: input, shape index: {}]   ;;  %s1855_s3 = inlined_call_operand.hbm [shape: f32[16,256], index: 3, kind: input, shape index: {}]   ;;  %s1856_s4 = inlined_call_operand.hbm [shape: f32[8,128], index: 4, kind: output, shape index: {}]  }
   0x1   :  { %10 = vsyncpa [#allocation6], 0 }
   0x2   :  { %11 = vsyncpa [#allocation9], 0 }
   0x3   :  { %12 = vsyncpa [#allocation4], 0  ;;  %s1681_s15 = smov [#allocation5]   ;;  %s1563_s19 = scalar_lea.hbm %s1853_s1, 8192 }
   0x4   :  { %s28_s16 = sshll.u32 %s1681_s15, 4  ;;  %p1564_p0 = scmp.ne.s32.totalorder %s1853_s1, %s1563_s19  ;;  %s29_s16 = int_to_ptr.vmem [resolvable:$true] %s28_s16 }
   0x5   :  { %p1567_p1 = scmp.lt.u32.totalorder %s1563_s19, %s1853_s1 }
   0x7   :  { %p1569_p2 = pnand %p1567_p1, %p1564_p0 }
   0x9   :  { %1572 = shalt.err (!%p1569_p2)
}
   0xa   :  { %s1573_s24 = scalar_lea.vmem %s29_s16, 8192  ;;  %p1578_p4 = scmp.lt.s32.totalorder %s29_s16, %s29_s16 }
   0xb   :  { %p1574_p3 = scmp.ne.s32.totalorder %s29_s16, %s1573_s24  ;;  %p1579_p5 = scmp.lt.s32.totalorder %s1573_s24, %s1573_s24 }
   0xd   :  { %p1580_p6 = por %p1579_p5, %p1578_p4 }
   0xf   :  { %p1581_p7 = pnand %p1580_p6, %p1574_p3 }
  0x11   :  { %1584 = shalt.err (!%p1581_p7)
}
  0x12   :  { %s1682_s25 = smov 64   ;;  %s1683_s26 = smov 4  }
  0x13   :  { %34 = dma.hbm_to_vmem [thread:$0]  %s1853_s1, 8192, %s29_s16, [#allocation6], %s1682_s25, %s1682_s25, %s1683_s26  }
  0x14   :  { %s1684_s29 = smov [#allocation2]   ;;  %s1685_s5 = smov [#allocation7]  }
  0x15   :  { %s19_s30 = sshll.u32 %s1684_s29, 4  ;;  %s40_s6 = sshll.u32 %s1685_s5, 4  ;;  %s20_s30 = int_to_ptr.vmem [resolvable:$true] %s19_s30  ;;  %s41_s6 = int_to_ptr.vmem [resolvable:$true] %s40_s6 }
  0x16   :  { %s1585_s9 = scalar_lea.hbm %s1852_s0, 256 }
  0x17   :  { %p1586_p8 = scmp.ne.s32.totalorder %s1852_s0, %s1585_s9  ;;  %p1589_p9 = scmp.lt.u32.totalorder %s1585_s9, %s1852_s0 }
  0x19   :  { %p1591_p10 = pnand %p1589_p9, %p1586_p8 }
  0x1b   :  { %1594 = shalt.err (!%p1591_p10)
}
  0x1c   :  { %s1595_s1 = scalar_lea.vmem %s20_s30, 256  ;;  %p1600_p12 = scmp.lt.s32.totalorder %s20_s30, %s20_s30 }
  0x1d   :  { %p1596_p11 = scmp.ne.s32.totalorder %s20_s30, %s1595_s1  ;;  %p1601_p13 = scmp.lt.s32.totalorder %s1595_s1, %s1595_s1 }
  0x1f   :  { %p1602_p0 = por %p1601_p13, %p1600_p12 }
  0x21   :  { %p1603_p1 = pnand %p1602_p0, %p1596_p11 }
  0x23   :  { %1606 = shalt.err (!%p1603_p1)
}
  0x24   :  { %22 = dma.hbm_to_vmem [thread:$0]  %s1852_s0, 256, %s20_s30, [#allocation3]  }
  0x25   :  { %s1607_s18 = scalar_lea.hbm %s1854_s2, 4096 }
  0x26   :  { %p1608_p2 = scmp.ne.s32.totalorder %s1854_s2, %s1607_s18  ;;  %p1611_p3 = scmp.lt.u32.totalorder %s1607_s18, %s1854_s2 }
  0x28   :  { %p1613_p4 = pnand %p1611_p3, %p1608_p2 }
  0x2a   :  { %1616 = shalt.err (!%p1613_p4)
}
  0x2b   :  { %s1617_s23 = scalar_lea.vmem %s41_s6, 4096  ;;  %p1622_p6 = scmp.lt.s32.totalorder %s41_s6, %s41_s6 }
  0x2c   :  { %p1618_p5 = scmp.ne.s32.totalorder %s41_s6, %s1617_s23  ;;  %p1623_p7 = scmp.lt.s32.totalorder %s1617_s23, %s1617_s23 }
  0x2e   :  { %p1624_p8 = por %p1623_p7, %p1622_p6 }
  0x30   :  { %p1625_p9 = pnand %p1624_p8, %p1618_p5 }
  0x32   :  { %1628 = shalt.err (!%p1625_p9)
}
  0x33   :  { %s1686_s0 = smov 128   ;;  %s1687_s24 = smov 8  }
  0x34   :  { %46 = dma.hbm_to_vmem [thread:$0]  %s1854_s2, 4096, %s41_s6, [#allocation6], %s1686_s0, %s1686_s0, %s1687_s24  }
  0x35   :  { %s1688_s27 = smov [#allocation8]   ;;  %s1629_s5 = scalar_lea.hbm %s1855_s3, 512 }
  0x36   :  { %s52_s28 = sshll.u32 %s1688_s27, 4  ;;  %p1630_p10 = scmp.ne.s32.totalorder %s1855_s3, %s1629_s5  ;;  %s53_s28 = int_to_ptr.vmem [resolvable:$true] %s52_s28 }
  0x37   :  { %p1633_p11 = scmp.lt.u32.totalorder %s1629_s5, %s1855_s3 }
  0x39   :  { %p1635_p12 = pnand %p1633_p11, %p1630_p10 }
  0x3b   :  { %1638 = shalt.err (!%p1635_p12)
}
  0x3c   :  { %s1639_s11 = scalar_lea.vmem %s53_s28, 512  ;;  %p1644_p0 = scmp.lt.s32.totalorder %s53_s28, %s53_s28 }
  0x3d   :  { %p1640_p13 = scmp.ne.s32.totalorder %s53_s28, %s1639_s11  ;;  %p1645_p1 = scmp.lt.s32.totalorder %s1639_s11, %s1639_s11 }
  0x3f   :  { %p1646_p2 = por %p1645_p1, %p1644_p0 }
  0x41   :  { %p1647_p3 = pnand %p1646_p2, %p1640_p13 }
  0x43   :  { %1650 = shalt.err (!%p1647_p3)
}
  0x44   :  { %s1689_s2 = smov 256   ;;  %s1690_s6 = smov 16  }
  0x45   :  { %58 = dma.hbm_to_vmem [thread:$0]  %s1855_s3, 512, %s53_s28, [#allocation9], %s1689_s2, %s1689_s2, %s1690_s6  }
  0x46   :  { %1673 = dma.done.wait [#allocation3], 256  }
  0x47   :  { %1674 = vsyncadd [#allocation3], 4294967040 }
  0x48   :  { %1675 = dma.done.wait [#allocation6], 12288  }
  0x49   :  { %1676 = vsyncadd [#allocation6], 4294955008 }
  0x4a   :  { %1677 = dma.done.wait [#allocation9], 512  }
  0x4b   :  { %1678 = vsyncadd [#allocation9], 4294966784  ;;  %v1443_v0 = vld [vmem:[#allocation5 + $0x40] sm:$0xff]   ;;  %v1445_v2 = vld [vmem:[#allocation5 + $0x48] sm:$0xff]   ;;  %v112_v22 = vlaneseq  ;;  %v1691_v43 = vmov 0   ;;  %vm1693_vm0 = vmmov 0  }
  0x4c   :  { %v1444_v1 = vld [vmem:[#allocation5] sm:$0xff]   ;;  %1305 = vmatprep.subr.bf16.mxu0 %v1443_v0  ;;  %v1446_v3 = vld [vmem:[#allocation5 + $0x8] sm:$0xff]   ;;  %v1447_v4 = vld [vmem:[#allocation5 + $0x50] sm:$0xff]   ;;  %413 = vmatprep.mubr.bf16.mxu1 %v1691_v43  ;;  %s1694_s3 = smov [#allocation10]  }
  0x4d   :  { %1306 = vmatpush3.bf16.msra.mxu0 %v1444_v1  ;;  %v1448_v5 = vld [vmem:[#allocation5 + $0x10] sm:$0xff]   ;;  %v1449_v6 = vld [vmem:[#allocation5 + $0x58] sm:$0xff]   ;;  %v1451_v8 = vld [vmem:[#allocation5 + $0x60] sm:$0xff]   ;;  %v1768_v23 = vshrl.u32 %v112_v22, 7  ;;  %s1198_s1 = sshll.u32 %s1694_s3, 4  ;;  %s1199_s1 = int_to_ptr.vmem [resolvable:$true] %s1198_s1 }
  0x4e   :  { %1307 = vmatprep.subr.bf16.mxu0 %v1445_v2  ;;  %v1450_v7 = vld [vmem:[#allocation5 + $0x18] sm:$0xff]   ;;  %v1452_v9 = vld [vmem:[#allocation5 + $0x20] sm:$0xff]   ;;  %v1453_v10 = vld [vmem:[#allocation5 + $0x68] sm:$0xff]   ;;  %s1651_s14 = scalar_lea.vmem %s1199_s1, 128  ;;  %p1656_p5 = scmp.lt.s32.totalorder %s1199_s1, %s1199_s1 }
  0x4f   :  { %v77_v11 = vld [vmem:[#allocation2 + $0x8] sm:$0xff]  ;;  %v1454_v12 = vld [vmem:[#allocation5 + $0x28] sm:$0xff]   ;;  %v1455_v14 = vld [vmem:[#allocation5 + $0x70] sm:$0xff]   ;;  %v1771_v24 = vsub.s32 0, %v1768_v23  ;;  %p1652_p4 = scmp.ne.s32.totalorder %s1199_s1, %s1651_s14  ;;  %p1657_p6 = scmp.lt.s32.totalorder %s1651_s14, %s1651_s14 }
  0x50   :  { %v111_v13 = vpack.c.bf16 %v77_v11, %v77_v11  ;;  %v1456_v15 = vld [vmem:[#allocation5 + $0x30] sm:$0xff]   ;;  %v1457_v16 = vld [vmem:[#allocation5 + $0x78] sm:$0xff]   ;;  %v1459_v20 = vld [vmem:[#allocation7 + $0x4] ss:$8 sps:$4 sm:$0xff]  }
  0x51   :  { %1308 = vmatpush3.bf16.msra.mxu0 %v1446_v3  ;;  %v1458_v17 = vld [vmem:[#allocation5 + $0x38] sm:$0xff]   ;;  %v76_v18 = vld [vmem:[#allocation2] sm:$0xff]  ;;  %v1461_v21 = vld [vmem:[#allocation7] ss:$8 sps:$4 sm:$0xff]   ;;  %381 = vmatprep.subr.bf16.mxu1 %v1459_v20  ;;  %p1658_p7 = por %p1657_p6, %p1656_p5 }
  0x52   :  { %1309 = vmatprep.subr.bf16.mxu0 %v1447_v4  ;;  %244 = vmatprep.mubr.bf16.mxu0 %v111_v13  ;;  %v110_v19 = vpack.c.bf16 %v76_v18, %v76_v18  ;;  %v1773_v25 = vld [vmem:[#allocation8] sm:$0xff]  ;;  %v1462_v34 = vld [vmem:[#allocation7 + $0x14] ss:$8 sps:$4 sm:$0xff]   ;;  %v1464_v35 = vld [vmem:[#allocation7 + $0x10] ss:$8 sps:$4 sm:$0xff]   ;;  %v268_v4 = vsub.s32 1, %v1768_v23 }
  0x53   :  { %382 = vmatpush1.bf16.msra.mxu1 %v1461_v21  ;;  %v115_v27 = vrot.slane %v1773_v25, %v1771_v24  ;;  %v1465_v36 = vld [vmem:[#allocation7 + $0x24] ss:$8 sps:$4 sm:$0xff]   ;;  %v1467_v37 = vld [vmem:[#allocation7 + $0x20] ss:$8 sps:$4 sm:$0xff]   ;;  %v1468_v38 = vld [vmem:[#allocation7 + $0x34] ss:$8 sps:$4 sm:$0xff]   ;;  %p1659_p8 = pnand %p1658_p7, %p1652_p4 }
  0x54   :  { %383 = vmatprep.subr.bf16.mxu1 %v1462_v34  ;;  %v1470_v39 = vld [vmem:[#allocation7 + $0x30] ss:$8 sps:$4 sm:$0xff]   ;;  %v1471_v40 = vld [vmem:[#allocation7 + $0x44] ss:$8 sps:$4 sm:$0xff]   ;;  %v1473_v41 = vld [vmem:[#allocation7 + $0x40] ss:$8 sps:$4 sm:$0xff]  }
  0x55   :  { %1310 = vmatpush3.bf16.msra.mxu0 %v1448_v5  ;;  %v1474_v42 = vld [vmem:[#allocation7 + $0x54] ss:$8 sps:$4 sm:$0xff]   ;;  %v1476_v44 = vld [vmem:[#allocation7 + $0x50] ss:$8 sps:$4 sm:$0xff]   ;;  %v1477_v45 = vld [vmem:[#allocation7 + $0x64] ss:$8 sps:$4 sm:$0xff]  }
  0x56   :  { %1311 = vmatprep.subr.bf16.mxu0 %v1449_v6  ;;  %v1479_v46 = vld [vmem:[#allocation7 + $0x60] ss:$8 sps:$4 sm:$0xff]   ;;  %v1480_v47 = vld [vmem:[#allocation7 + $0x74] ss:$8 sps:$4 sm:$0xff]   ;;  %v1482_v48 = vld [vmem:[#allocation7 + $0x70] ss:$8 sps:$4 sm:$0xff]  }
  0x57   :  { %384 = vmatpush1.bf16.msra.mxu1 %v1464_v35  ;;  %v1483_v49 = vld [vmem:[#allocation5 + $0xc0] sm:$0xff]   ;;  %v1485_v51 = vld [vmem:[#allocation5 + $0xc8] sm:$0xff]   ;;  %v1487_v53 = vld [vmem:[#allocation5 + $0xd0] sm:$0xff]   ;;  %v273_v5 = vsub.s32 2, %v1768_v23  ;;  %v295_v18 = vsub.s32 3, %v1768_v23 }
  0x58   :  { %385 = vmatprep.subr.bf16.mxu1 %v1465_v36  ;;  %v1484_v50 = vld [vmem:[#allocation5 + $0x80] sm:$0xff]   ;;  %v1486_v52 = vld [vmem:[#allocation5 + $0x88] sm:$0xff]   ;;  %v1488_v54 = vld [vmem:[#allocation5 + $0x90] sm:$0xff]   ;;  %v1692_v36 = vmov 0.0  }
  0x59   :  { %1312 = vmatpush3.bf16.msra.mxu0 %v1450_v7  ;;  %v1489_v55 = vld [vmem:[#allocation5 + $0xd8] sm:$0xff]   ;;  %v1491_v57 = vld [vmem:[#allocation5 + $0xe0] sm:$0xff]   ;;  %v1493_v59 = vld [vmem:[#allocation5 + $0xe8] sm:$0xff]   ;;  %v269_v7 = vrot.slane %v1773_v25, %v268_v4  ;;  %v296_v20 = vrot.slane %v1773_v25, %v295_v18 }
  0x5a   :  { %1313 = vmatprep.subr.bf16.mxu0 %v1451_v8  ;;  %v1490_v56 = vld [vmem:[#allocation5 + $0x98] sm:$0xff]   ;;  %v1492_v58 = vld [vmem:[#allocation5 + $0xa0] sm:$0xff]   ;;  %v1494_v60 = vld [vmem:[#allocation5 + $0xa8] sm:$0xff]  }
  0x5b   :  { %386 = vmatpush1.bf16.msra.mxu1 %v1467_v37  ;;  %v1499_v35 = vld [vmem:[#allocation5 + $0x100] sm:$0xff]   ;;  %v1500_v37 = vld [vmem:[#allocation5 + $0x108] sm:$0xff]  }
  0x5c   :  { %387 = vmatprep.subr.bf16.mxu1 %v1468_v38  ;;  %v597_v38 = vsub.s32 4, %v1768_v23 }
  0x5d   :  { %1314 = vmatpush3.bf16.msra.mxu0 %v1452_v9 }
  0x5e   :  { %1315 = vmatprep.subr.bf16.mxu0 %v1453_v10  ;;  %v274_v10 = vrot.slane %v1773_v25, %v273_v5 }
  0x5f   :  { %388 = vmatpush1.bf16.msra.mxu1 %v1470_v39 }
  0x60   :  { %389 = vmatprep.subr.bf16.mxu1 %v1471_v40 }
  0x61   :  { %1316 = vmatpush3.bf16.msra.mxu0 %v1454_v12 }
  0x62   :  { %1317 = vmatprep.subr.bf16.mxu0 %v1455_v14  ;;  %v1495_v14 = vld [vmem:[#allocation5 + $0xf0] sm:$0xff]  }
  0x63   :  { %390 = vmatpush1.bf16.msra.mxu1 %v1473_v41 }
  0x64   :  { %391 = vmatprep.subr.bf16.mxu1 %v1474_v42 }
  0x65   :  { %1318 = vmatpush3.bf16.msra.mxu0 %v1456_v15  ;;  %v1496_v15 = vld [vmem:[#allocation5 + $0xb0] sm:$0xff]  }
  0x66   :  { %1319 = vmatprep.subr.bf16.mxu0 %v1457_v16  ;;  %v1497_v16 = vld [vmem:[#allocation5 + $0xf8] sm:$0xff]  }
  0x67   :  { %392 = vmatpush1.bf16.msra.mxu1 %v1476_v44  ;;  %v598_v44 = vrot.slane %v1773_v25, %v597_v38  ;;  %v1538_v38 = vld [vmem:[#allocation5 + $0x158] sm:$0xff]  }
  0x68   :  { %393 = vmatprep.subr.bf16.mxu1 %v1477_v45 }
  0x69   :  { %1320 = vmatpush3.bf16.msra.mxu0 %v1458_v17  ;;  %v1498_v17 = vld [vmem:[#allocation5 + $0xb8] sm:$0xff]  }
  0x6a   :  { %1327 = vmatprep.subr.bf16.mxu0 %v1483_v49  ;;  %v1502_v49 = vld [vmem:[#allocation5 + $0x118] sm:$0xff]  }
  0x6b   :  { %394 = vmatpush1.bf16.msra.mxu1 %v1479_v46 }
  0x6c   :  { %245 = vmatmul.mubr.bf16.vlgmr.msra.gmra.mrb[0].mxu0 %v110_v19  ;;  %395 = vmatprep.subr.bf16.mxu1 %v1480_v47  ;;  %v73_v19 = vld [vmem:[#allocation8 + $0x8] sm:$0xff] }
  0x6d   :  { %1328 = vmatpush3.bf16.msra.mxu0 %v1484_v50  ;;  %v300_v21 = vrot.slane %v73_v19, %v295_v18  ;;  %v1503_v50 = vld [vmem:[#allocation5 + $0x120] sm:$0xff]   ;;  %v1516_v18 = vld [vmem:[#allocation7 + $0xb0] ss:$8 sps:$4 sm:$0xff]  }
  0x6e   :  { %1329 = vmatprep.subr.bf16.mxu0 %v1485_v51  ;;  %v1504_v51 = vld [vmem:[#allocation5 + $0x128] sm:$0xff]  }
  0x6f   :  { %396 = vmatpush1.bf16.msra.mxu1 %v1482_v48  ;;  %v1501_v48 = vld [vmem:[#allocation5 + $0x110] sm:$0xff]   ;;  %v1519_v19 = vld [vmem:[#allocation7 + $0xc0] ss:$8 sps:$4 sm:$0xff]  }
  0x70   :  { %1389 = vmatprep.subr.bf16.mxu1 %v1692_v36 }
  0x71   :  { %1330 = vmatpush3.bf16.msra.mxu0 %v1486_v52  ;;  %v1505_v52 = vld [vmem:[#allocation5 + $0x130] sm:$0xff]  }
  0x72   :  { %1331 = vmatprep.subr.bf16.mxu0 %v1487_v53  ;;  %v1506_v53 = vld [vmem:[#allocation5 + $0x138] sm:$0xff]  }
  0x75   :  { %1332 = vmatpush3.bf16.msra.mxu0 %v1488_v54 }
  0x76   :  { %1333 = vmatprep.subr.bf16.mxu0 %v1489_v55 }
  0x79   :  { %1334 = vmatpush3.bf16.msra.mxu0 %v1490_v56 }
  0x7a   :  { %1335 = vmatprep.subr.bf16.mxu0 %v1491_v57 }
  0x7d   :  { %1336 = vmatpush3.bf16.msra.mxu0 %v1492_v58 }
  0x7e   :  { %1337 = vmatprep.subr.bf16.mxu0 %v1493_v59 }
  0x81   :  { %1338 = vmatpush3.bf16.msra.mxu0 %v1494_v60 }
  0x82   :  { %1339 = vmatprep.subr.bf16.mxu0 %v1495_v14 }
  0x85   :  { %1340 = vmatpush3.bf16.msra.mxu0 %v1496_v15  ;;  %v1515_v15 = vld [vmem:[#allocation7 + $0xa4] ss:$8 sps:$4 sm:$0xff]  }
  0x86   :  { %1341 = vmatprep.subr.bf16.mxu0 %v1497_v16  ;;  %v1513_v16 = vld [vmem:[#allocation7 + $0xa0] ss:$8 sps:$4 sm:$0xff]  }
  0x89   :  { %1342 = vmatpush3.bf16.msra.mxu0 %v1498_v17  ;;  %v1518_v17 = vld [vmem:[#allocation7 + $0xb4] ss:$8 sps:$4 sm:$0xff]  }
 0x13f   :  { %v1321_v26 = vpop.f32.mrb[0].mxu0 }
 0x140   :  { %v1322_v28 = vpop.f32.mrb[1].mxu0 }
 0x141   :  { %v1323_v29 = vadd.f32 %v1322_v28, %v1321_v26  ;;  %v1324_v30 = vpop.f32.mrb[2].mxu0 }
 0x142   :  { %v1325_v31 = vpop.f32.mrb[3].mxu0 }
 0x143   :  { %v1777_v32 = vadd.f32 %v1323_v29, %v115_v27 }
 0x145   :  { %252 = vadd.xlane.f32.xlu0 %v1777_v32  ;;  %v256_v33 = vmul.f32 %v1777_v32, %v1777_v32 }
 0x149   :  { %257 = vadd.xlane.f32.xlu0 %v256_v33 }
 0x1d2   :  { %v253_v61 = vpop.xlane.xlu0 %252 }
 0x1d3   :  { %v255_v62 = vmul.f32 0.0078125, %v253_v61 }
 0x1d5   :  { %v260_v0 = vmul.f32 %v255_v62, %v255_v62  ;;  %v262_v6 = vsub.f32 %v1777_v32, %v255_v62 }
 0x1d6   :  { %v258_v63 = vpop.xlane.xlu0 %257 }
 0x1d7   :  { %v259_v1 = vmul.f32 0.0078125, %v258_v63 }
 0x1d9   :  { %v261_v2 = vsub.f32 %v259_v1, %v260_v0  ;;  %v1507_v1 = vld [vmem:[#allocation7 + $0x80] ss:$8 sps:$4 sm:$0xff]  }
 0x1db   :  { %v263_v3 = vadd.f32 1e-05, %v261_v2  ;;  %v1509_v2 = vld [vmem:[#allocation7 + $0x84] ss:$8 sps:$4 sm:$0xff]  }
 0x1dc   :  { %850 = vmatprep.subr.bf16.mxu0 %v1509_v2 }
 0x1dd   :  { %1555 = vrsqrt.f32 %v263_v3  ;;  %v1512_v3 = vld [vmem:[#allocation7 + $0x94] ss:$8 sps:$4 sm:$0xff]  }
 0x1e7   :  { %v1556_v8 = vpop.eup %1555 }
 0x1e8   :  { %v265_v9 = vmul.f32 %v1556_v8, %v262_v6  ;;  %v1510_v6 = vld [vmem:[#allocation7 + $0x90] ss:$8 sps:$4 sm:$0xff]  }
 0x1ea   :  { %v270_v11 = vmul.f32 %v269_v7, %v265_v9  ;;  %v632_v7 = vsub.s32 5, %v1768_v23 }
 0x1ec   :  { %v275_v12 = vadd.f32 %v274_v10, %v270_v11  ;;  %v633_v8 = vrot.slane %v1773_v25, %v632_v7 }
 0x1ee   :  { %v292_v13 = vpack.c.bf16 %v275_v12, %v275_v12 }
 0x1f0   :  { %414 = vmatmul.mubr.bf16.vlgmr.msra.gmra.mrb[0].mxu1 %v292_v13 }
 0x1f1   :  { %1390 = vmatpush3.bf16.msra.mxu1 %v1499_v35  ;;  %1405 = vmatprep.mubr.msk.bf16.mxu1 %vm1693_vm0, %v1692_v36  ;;  %v1536_v35 = vld [vmem:[#allocation5 + $0x150] sm:$0xff]  }
 0x1f2   :  { %1391 = vmatprep.subr.bf16.mxu1 %v1692_v36 }
 0x1f5   :  { %1392 = vmatpush3.bf16.msra.mxu1 %v1500_v37  ;;  %v1537_v37 = vld [vmem:[#allocation5 + $0x198] sm:$0xff]  }
 0x1f6   :  { %1393 = vmatprep.subr.bf16.mxu1 %v1692_v36 }
 0x1f9   :  { %1394 = vmatpush3.bf16.msra.mxu1 %v1501_v48 }
 0x1fa   :  { %1395 = vmatprep.subr.bf16.mxu1 %v1692_v36 }
 0x1fd   :  { %1396 = vmatpush3.bf16.msra.mxu1 %v1502_v49 }
 0x1fe   :  { %1397 = vmatprep.subr.bf16.mxu1 %v1692_v36 }
 0x201   :  { %1398 = vmatpush3.bf16.msra.mxu1 %v1503_v50  ;;  %v737_v50 = vsub.s32 6, %v1768_v23 }
 0x202   :  { %1399 = vmatprep.subr.bf16.mxu1 %v1692_v36 }
 0x205   :  { %1400 = vmatpush3.bf16.msra.mxu1 %v1504_v51  ;;  %v742_v51 = vsub.s32 7, %v1768_v23 }
 0x206   :  { %1401 = vmatprep.subr.bf16.mxu1 %v1692_v36 }
 0x209   :  { %1402 = vmatpush3.bf16.msra.mxu1 %v1505_v52 }
 0x20a   :  { %1403 = vmatprep.subr.bf16.mxu1 %v1692_v36 }
 0x20d   :  { %1404 = vmatpush3.bf16.msra.mxu1 %v1506_v53  ;;  %v738_v53 = vrot.slane %v1773_v25, %v737_v50 }
 0x2c3   :  { %v415_v22 = vpop.f32.mrb[0].mxu1 }
 0x2c4   :  { %v416_v26 = vadd.f32 %v415_v22, %v296_v20  ;;  %v417_v27 = vpop.f32.mrb[1].mxu1  ;;  %v1521_v20 = vld [vmem:[#allocation7 + $0xc4] ss:$8 sps:$4 sm:$0xff]   ;;  %v1522_v22 = vld [vmem:[#allocation7 + $0xd0] ss:$8 sps:$4 sm:$0xff]  }
 0x2c5   :  { %v418_v28 = vadd.f32 %v417_v27, %v300_v21  ;;  %v419_v29 = vpop.f32.mrb[2].mxu1  ;;  %v1524_v21 = vld [vmem:[#allocation7 + $0xd4] ss:$8 sps:$4 sm:$0xff]   ;;  %v1525_v27 = vld [vmem:[#allocation7 + $0xe0] ss:$8 sps:$4 sm:$0xff]  }
 0x2c6   :  { %v422_v30 = vmax.f32 %v416_v26, 0.0  ;;  %v420_v31 = vpop.f32.mrb[3].mxu1  ;;  %v1527_v26 = vld [vmem:[#allocation7 + $0xe4] ss:$8 sps:$4 sm:$0xff]   ;;  %v1528_v29 = vld [vmem:[#allocation7 + $0xf0] ss:$8 sps:$4 sm:$0xff]  }
 0x2c7   :  { %v423_v32 = vmax.f32 %v418_v28, 0.0  ;;  %v1530_v28 = vld [vmem:[#allocation7 + $0xf4] ss:$8 sps:$4 sm:$0xff]   ;;  %v1532_v31 = vld [vmem:[#allocation5 + $0x140] sm:$0xff]  }
 0x2c8   :  { %v456_v34 = vpack.c.bf16 %v422_v30, %v422_v30  ;;  %v1531_v30 = vld [vmem:[#allocation5 + $0x180] sm:$0xff]  }
 0x2c9   :  { %v457_v33 = vpack.c.bf16 %v423_v32, %v423_v32  ;;  %v1533_v32 = vld [vmem:[#allocation5 + $0x188] sm:$0xff]   ;;  %1358 = vmatprep.subr.bf16.mxu1 %v1531_v30  ;;  %v1551_v30 = vld [vmem:[#allocation5 + $0x1e0] sm:$0xff]  }
 0x2cb   :  { %586 = vmatprep.mubr.bf16.mxu0 %v457_v33  ;;  %v1534_v33 = vld [vmem:[#allocation5 + $0x148] sm:$0xff]  }
 0x2cc   :  { %587 = vmatmul.mubr.bf16.vlgmr.msra.gmra.mrb[4].mxu0 %v456_v34  ;;  %v1535_v34 = vld [vmem:[#allocation5 + $0x190] sm:$0xff]  }
 0x2cd   :  { %882 = vmatprep.mubr.bf16.mxu0 %v1691_v43  ;;  %851 = vmatpush1.bf16.msra.mxu0 %v1507_v1  ;;  %v75_v1 = vld [vmem:[#allocation8 + $0x18] sm:$0xff] }
 0x2ce   :  { %852 = vmatprep.subr.bf16.mxu0 %v1512_v3  ;;  %v769_v2 = vrot.slane %v75_v1, %v1771_v24 }
 0x2d1   :  { %853 = vmatpush1.bf16.msra.mxu0 %v1510_v6 }
 0x2d2   :  { %854 = vmatprep.subr.bf16.mxu0 %v1515_v15  ;;  %v1547_v15 = vld [vmem:[#allocation5 + $0x1c0] sm:$0xff]  }
 0x2d5   :  { %855 = vmatpush1.bf16.msra.mxu0 %v1513_v16  ;;  %v1548_v16 = vld [vmem:[#allocation5 + $0x1c8] sm:$0xff]  }
 0x2d6   :  { %856 = vmatprep.subr.bf16.mxu0 %v1518_v17 }
 0x2d9   :  { %857 = vmatpush1.bf16.msra.mxu0 %v1516_v18 }
 0x2da   :  { %858 = vmatprep.subr.bf16.mxu0 %v1521_v20 }
 0x2dd   :  { %859 = vmatpush1.bf16.msra.mxu0 %v1519_v19 }
 0x2de   :  { %860 = vmatprep.subr.bf16.mxu0 %v1524_v21 }
 0x2e1   :  { %861 = vmatpush1.bf16.msra.mxu0 %v1522_v22 }
 0x2e2   :  { %862 = vmatprep.subr.bf16.mxu0 %v1527_v26 }
 0x2e5   :  { %863 = vmatpush1.bf16.msra.mxu0 %v1525_v27 }
 0x2e6   :  { %864 = vmatprep.subr.bf16.mxu0 %v1530_v28  ;;  %v1549_v28 = vld [vmem:[#allocation5 + $0x1d0] sm:$0xff]  }
 0x2e9   :  { %865 = vmatpush1.bf16.msra.mxu0 %v1528_v29  ;;  %v1550_v29 = vld [vmem:[#allocation5 + $0x1d8] sm:$0xff]  }
 0x2ea   :  { %1409 = vmatprep.subr.bf16.mxu0 %v1692_v36 }
 0x39f   :  { %v1343_v39 = vpop.f32.mrb[4].mxu0 }
 0x3a0   :  { %v1344_v40 = vpop.f32.mrb[5].mxu0 }
 0x3a1   :  { %v1345_v41 = vadd.f32 %v1344_v40, %v1343_v39  ;;  %v1346_v42 = vpop.f32.mrb[6].mxu0  ;;  %v1539_v39 = vld [vmem:[#allocation5 + $0x1a0] sm:$0xff]  }
 0x3a2   :  { %v1347_v43 = vpop.f32.mrb[7].mxu0  ;;  %v1540_v40 = vld [vmem:[#allocation5 + $0x160] sm:$0xff]   ;;  %v1542_v42 = vld [vmem:[#allocation5 + $0x168] sm:$0xff]  }
 0x3a3   :  { %v594_v45 = vadd.f32 %v1345_v41, %v275_v12  ;;  %v1541_v41 = vld [vmem:[#allocation5 + $0x1a8] sm:$0xff]  }
 0x3a5   :  { %v599_v46 = vadd.f32 %v598_v44, %v594_v45 }
 0x3a7   :  { %600 = vadd.xlane.f32.xlu1 %v599_v46  ;;  %v603_v47 = vmul.f32 %v599_v46, %v599_v46 }
 0x3ab   :  { %604 = vadd.xlane.f32.xlu1 %v603_v47 }
 0x434   :  { %v601_v54 = vpop.xlane.xlu1 %600 }
 0x435   :  { %v602_v55 = vmul.f32 0.0078125, %v601_v54 }
 0x437   :  { %v607_v57 = vmul.f32 %v602_v55, %v602_v55  ;;  %v609_v61 = vsub.f32 %v599_v46, %v602_v55 }
 0x438   :  { %v605_v56 = vpop.xlane.xlu1 %604 }
 0x439   :  { %v606_v58 = vmul.f32 0.0078125, %v605_v56  ;;  %v743_v56 = vrot.slane %v1773_v25, %v742_v51 }
 0x43b   :  { %v608_v59 = vsub.f32 %v606_v58, %v607_v57 }
 0x43d   :  { %v610_v60 = vadd.f32 1e-05, %v608_v59 }
 0x43f   :  { %1557 = vrsqrt.f32 %v610_v60  ;;  %v1543_v60 = vld [vmem:[#allocation5 + $0x1b0] sm:$0xff]  }
 0x449   :  { %v1558_v62 = vpop.eup %1557 }
 0x44a   :  { %v612_v63 = vmul.f32 %v1558_v62, %v609_v61  ;;  %v1544_v61 = vld [vmem:[#allocation5 + $0x170] sm:$0xff]   ;;  %v1545_v62 = vld [vmem:[#allocation5 + $0x1b8] sm:$0xff]  }
 0x44c   :  { %v629_v0 = vpack.c.bf16 %v612_v63, %v612_v63  ;;  %v1546_v63 = vld [vmem:[#allocation5 + $0x178] sm:$0xff]  }
 0x44e   :  { %1406 = vmatmul.mubr.bf16.vlgmr.msra.gmra.mrb[4].mxu1 %v629_v0  ;;  %v1822_v0 = vld [vmem:[#allocation8 + $0x10] sm:$0xff] }
 0x44f   :  { %1359 = vmatpush3.bf16.msra.mxu1 %v1532_v31  ;;  %v765_v25 = vrot.slane %v1822_v0, %v1771_v24  ;;  %v1067_v20 = vrot.slane %v1822_v0, %v268_v4  ;;  %v1552_v31 = vld [vmem:[#allocation5 + $0x1e8] sm:$0xff]   ;;  %v1553_v4 = vld [vmem:[#allocation5 + $0x1f0] sm:$0xff]  }
 0x450   :  { %1360 = vmatprep.subr.bf16.mxu1 %v1533_v32  ;;  %v1554_v32 = vld [vmem:[#allocation5 + $0x1f8] sm:$0xff]  }
 0x453   :  { %1361 = vmatpush3.bf16.msra.mxu1 %v1534_v33 }
 0x454   :  { %1362 = vmatprep.subr.bf16.mxu1 %v1535_v34 }
 0x457   :  { %1363 = vmatpush3.bf16.msra.mxu1 %v1536_v35 }
 0x458   :  { %1364 = vmatprep.subr.bf16.mxu1 %v1537_v37 }
 0x45b   :  { %1365 = vmatpush3.bf16.msra.mxu1 %v1538_v38 }
 0x45c   :  { %1366 = vmatprep.subr.bf16.mxu1 %v1539_v39 }
 0x45f   :  { %1367 = vmatpush3.bf16.msra.mxu1 %v1540_v40 }
 0x460   :  { %1368 = vmatprep.subr.bf16.mxu1 %v1541_v41 }
 0x463   :  { %1369 = vmatpush3.bf16.msra.mxu1 %v1542_v42 }
 0x464   :  { %1370 = vmatprep.subr.bf16.mxu1 %v1543_v60 }
 0x467   :  { %1371 = vmatpush3.bf16.msra.mxu1 %v1544_v61 }
 0x468   :  { %1372 = vmatprep.subr.bf16.mxu1 %v1545_v62 }
 0x46b   :  { %1373 = vmatpush3.bf16.msra.mxu1 %v1546_v63 }
 0x521   :  { %v716_v9 = vpop.f32.mrb[4].mxu1 }
 0x522   :  { %v1809_v10 = vadd.f32 %v716_v9, %v633_v8  ;;  %v1407_v11 = vpop.f32.mrb[5].mxu1 }
 0x523   :  { %v719_v12 = vpop.f32.mrb[6].mxu1 }
 0x524   :  { %722 = vadd.xlane.f32.xlu0 %v1809_v10  ;;  %v1408_v13 = vpop.f32.mrb[7].mxu1  ;;  %v725_v14 = vmul.f32 %v1809_v10, %v1809_v10 }
 0x526   :  { %726 = vadd.xlane.f32.xlu1 %v725_v14 }
 0x5b1   :  { %v723_v44 = vpop.xlane.xlu0 %722 }
 0x5b2   :  { %v724_v43 = vmul.f32 0.0078125, %v723_v44 }
 0x5b3   :  { %v727_v45 = vpop.xlane.xlu1 %726 }
 0x5b4   :  { %v729_v46 = vmul.f32 %v724_v43, %v724_v43  ;;  %v728_v47 = vmul.f32 0.0078125, %v727_v45  ;;  %v731_v52 = vsub.f32 %v1809_v10, %v724_v43  ;;  %v1102_v45 = vrot.slane %v1822_v0, %v273_v5 }
 0x5b6   :  { %v730_v48 = vsub.f32 %v728_v47, %v729_v46 }
 0x5b8   :  { %v732_v49 = vadd.f32 1e-05, %v730_v48 }
 0x5ba   :  { %1559 = vrsqrt.f32 %v732_v49 }
 0x5c4   :  { %v1560_v54 = vpop.eup %1559 }
 0x5c5   :  { %v734_v55 = vmul.f32 %v1560_v54, %v731_v52 }
 0x5c7   :  { %v739_v57 = vmul.f32 %v738_v53, %v734_v55 }
 0x5c9   :  { %v744_v58 = vadd.f32 %v743_v56, %v739_v57 }
 0x5cb   :  { %v761_v59 = vpack.c.bf16 %v744_v58, %v744_v58 }
 0x5cd   :  { %883 = vmatmul.mubr.bf16.vlgmr.msra.gmra.mrb[8].mxu0 %v761_v59 }
 0x5ce   :  { %1425 = vmatprep.mubr.msk.bf16.mxu0 %vm1693_vm0, %v1692_v36  ;;  %1410 = vmatpush3.bf16.msra.mxu0 %v1547_v15 }
 0x5cf   :  { %1411 = vmatprep.subr.bf16.mxu0 %v1692_v36 }
 0x5d2   :  { %1412 = vmatpush3.bf16.msra.mxu0 %v1548_v16 }
 0x5d3   :  { %1413 = vmatprep.subr.bf16.mxu0 %v1692_v36 }
 0x5d6   :  { %1414 = vmatpush3.bf16.msra.mxu0 %v1549_v28 }
 0x5d7   :  { %1415 = vmatprep.subr.bf16.mxu0 %v1692_v36 }
 0x5da   :  { %1416 = vmatpush3.bf16.msra.mxu0 %v1550_v29 }
 0x5db   :  { %1417 = vmatprep.subr.bf16.mxu0 %v1692_v36 }
 0x5de   :  { %1418 = vmatpush3.bf16.msra.mxu0 %v1551_v30 }
 0x5df   :  { %1419 = vmatprep.subr.bf16.mxu0 %v1692_v36 }
 0x5e2   :  { %1420 = vmatpush3.bf16.msra.mxu0 %v1552_v31 }
 0x5e3   :  { %1421 = vmatprep.subr.bf16.mxu0 %v1692_v36 }
 0x5e6   :  { %1422 = vmatpush3.bf16.msra.mxu0 %v1553_v4 }
 0x5e7   :  { %1423 = vmatprep.subr.bf16.mxu0 %v1692_v36 }
 0x5ea   :  { %1424 = vmatpush3.bf16.msra.mxu0 %v1554_v32 }
 0x6a0   :  { %v884_v3 = vpop.f32.mrb[8].mxu0 }
 0x6a1   :  { %v885_v6 = vadd.f32 %v884_v3, %v765_v25  ;;  %v886_v7 = vpop.f32.mrb[9].mxu0 }
 0x6a2   :  { %v887_v8 = vadd.f32 %v886_v7, %v769_v2  ;;  %v888_v9 = vpop.f32.mrb[10].mxu0 }
 0x6a3   :  { %v891_v10 = vmax.f32 %v885_v6, 0.0  ;;  %v889_v11 = vpop.f32.mrb[11].mxu0 }
 0x6a4   :  { %v892_v12 = vmax.f32 %v887_v8, 0.0 }
 0x6a5   :  { %v925_v14 = vpack.c.bf16 %v891_v10, %v891_v10 }
 0x6a6   :  { %v926_v13 = vpack.c.bf16 %v892_v12, %v892_v12 }
 0x6a8   :  { %1055 = vmatprep.mubr.bf16.mxu1 %v926_v13 }
 0x6a9   :  { %1056 = vmatmul.mubr.bf16.vlgmr.msra.gmra.mrb[8].mxu1 %v925_v14 }
 0x77c   :  { %v1374_v24 = vpop.f32.mrb[8].mxu1 }
 0x77d   :  { %v1375_v17 = vpop.f32.mrb[9].mxu1 }
 0x77e   :  { %v1376_v18 = vadd.f32 %v1375_v17, %v1374_v24  ;;  %v1377_v19 = vpop.f32.mrb[10].mxu1 }
 0x77f   :  { %v1378_v21 = vpop.f32.mrb[11].mxu1 }
 0x780   :  { %v1063_v22 = vadd.f32 %v1376_v18, %v744_v58 }
 0x782   :  { %v1068_v26 = vadd.f32 %v1067_v20, %v1063_v22 }
 0x784   :  { %1069 = vadd.xlane.f32.xlu0 %v1068_v26  ;;  %v1072_v27 = vmul.f32 %v1068_v26, %v1068_v26 }
 0x786   :  { %1073 = vadd.xlane.f32.xlu1 %v1072_v27 }
 0x811   :  { %v1070_v33 = vpop.xlane.xlu0 %1069 }
 0x812   :  { %v1071_v34 = vmul.f32 0.0078125, %v1070_v33 }
 0x813   :  { %v1074_v35 = vpop.xlane.xlu1 %1073 }
 0x814   :  { %v1076_v37 = vmul.f32 %v1071_v34, %v1071_v34  ;;  %v1075_v38 = vmul.f32 0.0078125, %v1074_v35  ;;  %v1078_v41 = vsub.f32 %v1068_v26, %v1071_v34 }
 0x816   :  { %v1077_v39 = vsub.f32 %v1075_v38, %v1076_v37 }
 0x818   :  { %v1079_v40 = vadd.f32 1e-05, %v1077_v39 }
 0x81a   :  { %1561 = vrsqrt.f32 %v1079_v40 }
 0x824   :  { %v1562_v42 = vpop.eup %1561 }
 0x825   :  { %v1081_v44 = vmul.f32 %v1562_v42, %v1078_v41 }
 0x827   :  { %v1098_v43 = vpack.c.bf16 %v1081_v44, %v1081_v44 }
 0x829   :  { %1426 = vmatmul.mubr.bf16.vlgmr.msra.gmra.mrb[12].mxu0 %v1098_v43 }
 0x8fc   :  { %v1185_v36 = vpop.f32.mrb[12].mxu0 }
 0x8fd   :  { %v1186_v46 = vadd.f32 %v1185_v36, %v1102_v45  ;;  %v1427_v47 = vpop.f32.mrb[13].mxu0 }
 0x8fe   :  { %v1188_v48 = vpop.f32.mrb[14].mxu0 }
 0x8ff   :  { %1191 = vst [vmem:[#allocation10] sm:$0xff] %v1186_v46  ;;  %v1428_v49 = vpop.f32.mrb[15].mxu0 }
 0x900   :  { %1662 = shalt.err (!%p1659_p8)
}
 0x901   :  { %s1663_s17 = scalar_lea.hbm %s1856_s4, 128 }
 0x902   :  { %p1664_p9 = scmp.ne.s32.totalorder %s1856_s4, %s1663_s17  ;;  %p1667_p10 = scmp.lt.u32.totalorder %s1663_s17, %s1856_s4 }
 0x904   :  { %p1669_p11 = pnand %p1667_p10, %p1664_p9 }
 0x906   :  { %1672 = shalt.err (!%p1669_p11)
}
 0x907   :  { %1201 = dma.vmem_to_hbm [thread:$0]  %s1199_s1, 128, %s1856_s4, [#allocation4]  }
 0x908   :  { %1679 = dma.done.wait [#allocation4], 128  }
 0x909   :  { %1680 = vsyncadd [#allocation4], 4294967168 }
 0x90a   :  { %1205 = vsyncpa [#allocation3], 1 }
 0x90b   :  { %1206 = vsyncpa [#allocation6], 1 }
 0x90c   :  { %1207 = vsyncpa [#allocation9], 1 }
 0x90d   :  { %1208 = vsyncpa [#allocation4], 1 }

</bundles_post_ra>
